<compile_context>
chip_gen: v6e
topology: v6e:2x2x1
jax: 0.10.0
libtpu: 0.0.40
codegen_flags: <defaults>
</compile_context>

<pallas_src>
import jax
import jax.numpy as jnp
from jax.experimental import pallas as pl


# ----------------------------------------------------------------------------
# Pallas kernel: the whole conv is one matmul.
#   lhs[b*H+i, p*Kh*Cin + kh*Cin + ci] = x_pad[b, i+kh-1, p, ci]   (row im2col)
#   wcat[p*Kh*Cin + kh*Cin + ci, j*Cout + co] = w[co, ci, kh, p-j+pad]  (Toeplitz)
# so  out[b*H+i, j*Cout+co] = conv(x, w)[b, i, j, co]  (+ bias).
# Output tile is lane-dense (N = W*Cout = 128).
# ----------------------------------------------------------------------------
def _conv_matmul_kernel(lhs_ref, w_ref, b_ref, o_ref):
    # lhs_ref: (M, Kt)  f32   im2col-over-rows activations (M = B*H, Kt = W*Kh*Cin)
    # w_ref:   (Kt, N)  bf16  block-Toeplitz weight slab   (N = W*Cout)
    # b_ref:   (1, N)   f32   bias tiled across width
    # o_ref:   (M, N)   f32
    lhs = lhs_ref[...].astype(jnp.bfloat16)        # cast hidden under the DMA
    acc = jnp.dot(lhs, w_ref[...], preferred_element_type=jnp.float32)
    o_ref[...] = (acc + b_ref[...]).astype(o_ref.dtype)


def _conv2d_forward(x_nchw, wcat, bias_row):
    """Conv2d, stride=1, 'same' padding, via a single fused-matmul Pallas kernel.

    x_nchw:   (B, Cin, H, W)        float32
    wcat:     (W*Kh*Cin, W*Cout)    bfloat16   pre-packed block-Toeplitz slab
    bias_row: (1, W*Cout)           float32    pre-tiled bias
    returns   (B, Cout, H, W)       float32
    """
    B, Cin, H, W = x_nchw.shape
    N = wcat.shape[1]                        # W * Cout
    Cout = N // W
    Kh = wcat.shape[0] // (W * Cin)          # kernel height (3)
    pad = Kh // 2

    # Cheap glue (fuses into ~1 XLA copy): NHWC, pad rows only, im2col over kh.
    # Width padding is already folded into the Toeplitz weight slab.
    x_nhwc = jnp.transpose(x_nchw, (0, 2, 3, 1))                       # (B,H,W,Cin)
    x_hpad = jnp.pad(x_nhwc, ((0, 0), (pad, pad), (0, 0), (0, 0)))     # (B,H+2,W,Cin)
    parts = [x_hpad[:, kh:kh + H] for kh in range(Kh)]                 # (B,H,W,Cin) each
    lhs = jnp.stack(parts, axis=3).reshape(B * H, W * Kh * Cin)        # (B*H, Kt) f32

    M, Kt = lhs.shape

    out = pl.pallas_call(
        _conv_matmul_kernel,
        out_shape=jax.ShapeDtypeStruct((M, N), jnp.float32),
        in_specs=[
            pl.BlockSpec((M, Kt), lambda: (0, 0)),
            pl.BlockSpec((Kt, N), lambda: (0, 0)),
            pl.BlockSpec((1, N), lambda: (0, 0)),
        ],
        out_specs=pl.BlockSpec((M, N), lambda: (0, 0)),
        cost_estimate=pl.CostEstimate(
            flops=2 * M * Kt * N,
            transcendentals=0,
            bytes_accessed=M * Kt * 4 + Kt * N * 2 + N * 4 + M * N * 4,
        ),
    )(lhs, wcat, bias_row)

    out = out.reshape(B, H, W, Cout)
    # NCHW for parity with the wrapped nn.Conv2d (transpose intentionally
    # outside the kernel so the kernel's stores stay lane-dense).
    return jnp.transpose(out, (0, 3, 1, 2))


# ----------------------------------------------------------------------------
# GradSampleModule equivalent: forward(x) == wrapped_module(x)
# ----------------------------------------------------------------------------
class GradSampleModuleJAX:
    """Forward-pass equivalent of opacus GradSampleModule wrapping a Conv2d."""

    GRAD_SAMPLERS = {}

    def __init__(self, weight, bias, *, batch_first=True, loss_reduction="mean"):
        # Hook / grad-sample bookkeeping only affects backward; kept for parity.
        self.batch_first = batch_first
        self.loss_reduction = loss_reduction
        self.hooks_enabled = True
        self.weight = weight                  # (Cout, Cin, K, K) float32, OIHW
        self.bias = bias                      # (Cout,) float32
        self._packed = {}                     # input width -> (wcat, bias_row)
        self._forward = jax.jit(_conv2d_forward)

    def _packed_params(self, W):
        """Block-Toeplitz weight slab + tiled bias, built once per input width.

        Hoisted out of the per-call path: these depend only on the module
        parameters and the spatial width.
        """
        if W not in self._packed:
            Cout, Cin, Kh, Kw = self.weight.shape
            pad = Kw // 2
            w_hwio = jnp.transpose(self.weight, (2, 3, 1, 0))            # (Kh,Kw,Cin,Cout)
            # E[kw, p, j] = 1 iff input column p feeds output column j at tap kw
            # (out-of-range taps vanish -> implicit zero padding along width).
            p_idx = jnp.arange(W)
            j_idx = jnp.arange(W)
            kw_idx = jnp.arange(Kw)
            E = (p_idx[None, :, None]
                 == j_idx[None, None, :] + kw_idx[:, None, None] - pad)
            E = E.astype(jnp.float32)                                    # (Kw, W, W)
            # wcat[p*Kh*Cin + kh*Cin + ci, j*Cout + co] = w[co, ci, kh, p-j+pad]
            wcat = jnp.einsum("kpj,hkio->phijo", E, w_hwio)              # (W,Kh,Cin,W,Cout)
            wcat = wcat.reshape(W * Kh * Cin, W * Cout).astype(jnp.bfloat16)
            # Lane-dense output assumption: N = W*Cout (128 here). For other
            # shapes the kernel is still correct, just stores become masked.
            bias_row = jnp.tile(self.bias.astype(jnp.float32), W).reshape(1, W * Cout)
            self._packed[W] = (wcat, bias_row)
        return self._packed[W]

    def __call__(self, x):
        # forward(self, x): return self._module(x)
        wcat, bias_row = self._packed_params(x.shape[-1])
        return self._forward(x, wcat, bias_row)


if __name__ == "__main__":
    key = jax.random.PRNGKey(0)
    k_x, k_w, k_b = jax.random.split(key, 3)

    B, Cin, H, W = 2, 4, 16, 16
    Cout, K = 8, 3

    x = jax.random.normal(k_x, (B, Cin, H, W), dtype=jnp.float32)
    # deterministic synthetic parameters (shapes match nn.Conv2d(4, 8, 3, padding=1))
    fan_in = Cin * K * K
    weight = jax.random.normal(k_w, (Cout, Cin, K, K), dtype=jnp.float32) / jnp.sqrt(fan_in)
    bias = jax.random.normal(k_b, (Cout,), dtype=jnp.float32) * 0.1

    model = GradSampleModuleJAX(weight, bias, batch_first=True, loss_reduction="mean")
    out = jax.block_until_ready(model(x))

    # sanity check against XLA's native conv (forward semantics of nn.Conv2d).
    # Tolerance accounts for bf16 rounding of the matmul operands (f32 accumulation).
    ref = jax.lax.conv_general_dilated(
        x, weight, window_strides=(1, 1), padding=((1, 1), (1, 1)),
        dimension_numbers=("NCHW", "OIHW", "NCHW"),
    ) + bias.reshape(1, Cout, 1, 1)
    assert out.shape == (B, Cout, H, W)
    assert jnp.allclose(out, ref, rtol=5e-2, atol=5e-2)

    print("KERNEL_OK")
</pallas_src>

<mosaic_0001>
module attributes {stable_mosaic.version = 11 : i64} {
  func.func @_conv_matmul_kernel(%arg0: memref<32x192xf32, #tpu.memory_space<vmem>>, %arg1: memref<192x128xbf16, #tpu.memory_space<vmem>>, %arg2: memref<1x128xf32, #tpu.memory_space<vmem>>, %arg3: memref<32x128xf32, #tpu.memory_space<vmem>>) attributes {dimension_semantics = [], scalar_prefetch = 0 : i64, scratch_operands = 0 : i64, tpu.core_type = #tpu.core_type<tc>} {
    %c0 = arith.constant 0 : index
    %c0_0 = arith.constant 0 : index
    %0 = vector.load %arg0[%c0, %c0_0] : memref<32x192xf32, #tpu.memory_space<vmem>>, vector<32x192xf32>
    %1 = arith.truncf %0 : vector<32x192xf32> to vector<32x192xbf16>
    %c0_1 = arith.constant 0 : index
    %c0_2 = arith.constant 0 : index
    %2 = vector.load %arg1[%c0_1, %c0_2] : memref<192x128xbf16, #tpu.memory_space<vmem>>, vector<192x128xbf16>
    %cst = arith.constant dense<0.000000e+00> : vector<32x128xf32>
    %3 = tpu.matmul %1, %2, %cst {dimension_numbers = #tpu.dot_dimension_numbers<[1], [0], [0], [1], [0, 0, 1, 1], [], []>} : vector<32x192xbf16>, vector<192x128xbf16>, vector<32x128xf32> -> vector<32x128xf32>
    %c0_3 = arith.constant 0 : index
    %c0_4 = arith.constant 0 : index
    %4 = vector.load %arg2[%c0_3, %c0_4] : memref<1x128xf32, #tpu.memory_space<vmem>>, vector<1x128xf32>
    %5 = vector.broadcast %4 : vector<1x128xf32> to vector<32x128xf32>
    %6 = arith.addf %3, %5 : vector<32x128xf32>
    %c0_5 = arith.constant 0 : index
    %c0_6 = arith.constant 0 : index
    %7 = vector.load %arg3[%c0_5, %c0_6] : memref<32x128xf32, #tpu.memory_space<vmem>>, vector<32x128xf32>
    tpu.vector_store %arg3[%c0_5, %c0_6], %6 {strides = array<i32>} : memref<32x128xf32, #tpu.memory_space<vmem>>, vector<32x128xf32>,
    return
  }
}

</mosaic_0001>

<bundles_post_ra>
// kernel: _conv2d_forward.1
= control target key start
LH: loop header
LB: loop body
LE: loop exit
PB: predicated region body
PF: predicated region fallthrough
CT: control target
= control target key end

     0   :  { %v246_v0 = vmov 0   ;;  %vm130_vm0 = vcmask 523264   ;;  %s366_s1 = inlined_call_operand.vmem [shape: bf16[192,128], index: 1, kind: input, shape index: {}]   ;;  %s367_s0 = inlined_call_operand.vmem [shape: f32[32,192], index: 0, kind: input, shape index: {}]   ;;  %s368_s2 = inlined_call_operand.vmem [shape: f32[1,128], index: 2, kind: input, shape index: {}]   ;;  %s369_s3 = inlined_call_operand.vmem [shape: f32[32,128], index: 3, kind: output, shape index: {}]  }
   0x1   :  { %137 = vmatprep.subr.bf16.mxu0 %v246_v0  ;;  %209 = vmatprep.subr.bf16.mxu1 %v246_v0  ;;  %v234_v1 = vld [vmem:[%s366_s1 + $0x38] sm:$0xff]   ;;  %v235_v2 = vld [vmem:[%s366_s1 + $0x30] sm:$0xff]   ;;  %v236_v3 = vld [vmem:[%s366_s1 + $0x28] sm:$0xff]  }
   0x2   :  { %138 = vmatpush1.bf16.msra.mxu0 %v234_v1  ;;  %221 = vmatpush1.bf16.msra.mxu1 %v234_v1  ;;  %v237_v4 = vld [vmem:[%s366_s1 + $0x20] sm:$0xff]   ;;  %v16_v5 = vld [vmem:[%s367_s0 + $0x8] sm:$0xff]  ;;  %v18_v6 = vld [vmem:[%s367_s0 + $0x18] sm:$0xff] }
   0x3   :  { %139 = vmatprep.subr.bf16.mxu0 %v246_v0  ;;  %210 = vmatprep.subr.bf16.mxu1 %v246_v0  ;;  %v20_v7 = vld [vmem:[%s367_s0 + $0x28] sm:$0xff]  ;;  %v24_v8 = vpack.c.bf16 %v18_v6, %v16_v5  ;;  %v22_v9 = vld [vmem:[%s367_s0 + $0x38] sm:$0xff]  ;;  %v239_v12 = vld [vmem:[%s366_s1 + $0x10] sm:$0xff]  }
   0x4   :  { %v238_v10 = vld [vmem:[%s366_s1 + $0x18] sm:$0xff]   ;;  %v26_v11 = vpack.c.bf16 %v22_v9, %v20_v7  ;;  %v240_v13 = vld [vmem:[%s366_s1 + $0x8] sm:$0xff]   ;;  %v241_v14 = vld [vmem:[%s366_s1] sm:$0xff]  }
   0x5   :  { %207 = vmatprep.mubr.msk.bf16.mxu0 %vm130_vm0, %v24_v8  ;;  %v242_v15 = vld [vmem:[%s366_s1 + $0x58] sm:$0xff]   ;;  %v243_v16 = vld [vmem:[%s366_s1 + $0x50] sm:$0xff]   ;;  %v244_v17 = vld [vmem:[%s366_s1 + $0x48] sm:$0xff]  }
   0x6   :  { %140 = vmatpush1.bf16.msra.mxu0 %v235_v2  ;;  %222 = vmatpush1.bf16.msra.mxu1 %v235_v2  ;;  %v245_v18 = vld [vmem:[%s366_s1 + $0x40] sm:$0xff]   ;;  %v17_v20 = vld [vmem:[%s367_s0 + $0x10] sm:$0xff] }
   0x7   :  { %141 = vmatprep.subr.bf16.mxu0 %v246_v0  ;;  %211 = vmatprep.subr.bf16.mxu1 %v246_v0  ;;  %v15_v19 = vld [vmem:[%s367_s0] sm:$0xff]  ;;  %v21_v22 = vld [vmem:[%s367_s0 + $0x30] sm:$0xff] }
   0x8   :  { %208 = vmatprep.mubr.msk.bf16.mxu1 %vm130_vm0, %v26_v11  ;;  %v19_v21 = vld [vmem:[%s367_s0 + $0x20] sm:$0xff]  ;;  %v23_v23 = vpack.c.bf16 %v17_v20, %v15_v19 }
   0x9   :  { %v25_v24 = vpack.c.bf16 %v21_v22, %v19_v21  ;;  %v194_v25 = vld [vmem:[%s368_s2] ss:$0 sm:$0xff] }
   0xa   :  { %142 = vmatpush1.bf16.msra.mxu0 %v236_v3  ;;  %223 = vmatpush1.bf16.msra.mxu1 %v236_v3 }
   0xb   :  { %143 = vmatprep.subr.bf16.mxu0 %v246_v0  ;;  %212 = vmatprep.subr.bf16.mxu1 %v246_v0 }
   0xe   :  { %144 = vmatpush1.bf16.msra.mxu0 %v237_v4  ;;  %224 = vmatpush1.bf16.msra.mxu1 %v237_v4 }
   0xf   :  { %145 = vmatprep.subr.bf16.mxu0 %v246_v0  ;;  %213 = vmatprep.subr.bf16.mxu1 %v246_v0 }
  0x12   :  { %146 = vmatpush1.bf16.msra.mxu0 %v238_v10  ;;  %225 = vmatpush1.bf16.msra.mxu1 %v238_v10 }
  0x13   :  { %147 = vmatprep.subr.bf16.mxu0 %v246_v0  ;;  %214 = vmatprep.subr.bf16.mxu1 %v246_v0 }
  0x16   :  { %148 = vmatpush1.bf16.msra.mxu0 %v239_v12  ;;  %226 = vmatpush1.bf16.msra.mxu1 %v239_v12 }
  0x17   :  { %149 = vmatprep.subr.bf16.mxu0 %v246_v0  ;;  %215 = vmatprep.subr.bf16.mxu1 %v246_v0 }
  0x1a   :  { %150 = vmatpush1.bf16.msra.mxu0 %v240_v13  ;;  %227 = vmatpush1.bf16.msra.mxu1 %v240_v13 }
  0x1b   :  { %151 = vmatprep.subr.bf16.mxu0 %v246_v0  ;;  %216 = vmatprep.subr.bf16.mxu1 %v246_v0 }
  0x1e   :  { %152 = vmatpush1.bf16.msra.mxu0 %v241_v14  ;;  %228 = vmatpush1.bf16.msra.mxu1 %v241_v14 }
  0x1f   :  { %161 = vmatprep.subr.bf16.mxu0 %v246_v0  ;;  %217 = vmatprep.subr.bf16.mxu1 %v246_v0 }
  0x22   :  { %162 = vmatpush2.bf16.msra.mxu0 %v242_v15  ;;  %229 = vmatpush2.bf16.msra.mxu1 %v242_v15 }
  0x23   :  { %163 = vmatprep.subr.bf16.mxu0 %v246_v0  ;;  %218 = vmatprep.subr.bf16.mxu1 %v246_v0 }
  0x26   :  { %164 = vmatpush2.bf16.msra.mxu0 %v243_v16  ;;  %230 = vmatpush2.bf16.msra.mxu1 %v243_v16 }
  0x27   :  { %165 = vmatprep.subr.bf16.mxu0 %v246_v0  ;;  %219 = vmatprep.subr.bf16.mxu1 %v246_v0 }
  0x2a   :  { %166 = vmatpush2.bf16.msra.mxu0 %v244_v17  ;;  %231 = vmatpush2.bf16.msra.mxu1 %v244_v17 }
  0x2b   :  { %167 = vmatprep.subr.bf16.mxu0 %v246_v0  ;;  %220 = vmatprep.subr.bf16.mxu1 %v246_v0 }
  0x2e   :  { %168 = vmatpush2.bf16.msra.mxu0 %v245_v18  ;;  %232 = vmatpush2.bf16.msra.mxu1 %v245_v18 }
  0x31   :  { %170 = vmatmul.mubr.bf16.vlgmr.msra.gmra.mxu0 %v23_v23  ;;  %178 = vmatmul.mubr.bf16.vlgmr.msra.gmra.mxu1 %v25_v24 }
  0xf1   :  { %v171_v26 = vpop.f32.mrf.mxu0  ;;  %v179_v27 = vpop.f32.mrf.mxu1 }
  0xf2   :  { %v172_v28 = vadd.f32 %v194_v25, %v171_v26  ;;  %v180_v29 = vadd.f32 %v194_v25, %v179_v27 }
  0xf3   :  { %v173_v30 = vpop.f32.mrf.mxu0  ;;  %v181_v31 = vpop.f32.mrf.mxu1 }
  0xf4   :  { %186 = vst [vmem:[%s369_s3] sm:$0xff] %v172_v28  ;;  %188 = vst [vmem:[%s369_s3 + $0x10] sm:$0xff] %v180_v29 }
  0xf5   :  { %v174_v32 = vpop.f32.mrf.mxu0  ;;  %v182_v33 = vpop.f32.mrf.mxu1 }
  0xf6   :  { %v175_v34 = vadd.f32 %v194_v25, %v174_v32  ;;  %v183_v35 = vadd.f32 %v194_v25, %v182_v33 }
  0xf7   :  { %v176_v36 = vpop.f32.mrf.mxu0  ;;  %v184_v37 = vpop.f32.mrf.mxu1 }
  0xf8   :  { %187 = vst [vmem:[%s369_s3 + $0x8] sm:$0xff] %v175_v34  ;;  %189 = vst [vmem:[%s369_s3 + $0x18] sm:$0xff] %v183_v35 }

</bundles_post_ra>
